<compile_context>
chip_gen: v7x
topology: tpu7x:2x2x1
jax: 0.10.0
libtpu: 0.0.40
codegen_flags: <defaults>
</compile_context>

<pallas_src>
import functools

import jax
import jax.numpy as jnp
from jax.experimental import pallas as pl
from jax.experimental.pallas import tpu as pltpu


def _quantile_conv_kernel(w_ref, mask_ref, x_ref, o_ref, *, W, HW):
    # w_ref:    SMEM (12,) = [w0, w1, w2, bias] x {lower, median, upper}
    # mask_ref: VMEM (8, HW) halo masks; row 0 = prev-row mask, row 1 = next-row mask
    # x_ref:    VMEM (Nb, HW)    flattened single-channel images (one row = one image)
    # o_ref:    VMEM (Nb, 3*HW)  three quantile heads side by side along the lane axis
    x = x_ref[...]                               # (Nb, HW)
    m_prev = mask_ref[0:1, :]                    # (1, HW), broadcasts over the batch rows
    m_next = mask_ref[1:2, :]

    # tap at row h-1: shift rows down by one (= +W along the flat axis); the
    # wrapped row-0 halo is zeroed by m_prev (matches Conv2d zero padding (1,0)).
    x_prev = pltpu.roll(x, W, axis=1) * m_prev
    # tap at row h+1: shift rows up by one (= -W); zero the wrapped row-(H-1) halo.
    x_next = pltpu.roll(x, HW - W, axis=1) * m_next

    for q in range(3):                           # unrolled over the 3 quantile heads
        w0 = w_ref[4 * q + 0]
        w1 = w_ref[4 * q + 1]
        w2 = w_ref[4 * q + 2]
        b = w_ref[4 * q + 3]
        # direct per-head store: static lane-slice start is a multiple of 128
        # (HW % 128 == 0), so the store path stays unmasked vst — no concat temp.
        o_ref[:, q * HW:(q + 1) * HW] = w0 * x_prev + w1 * x + w2 * x_next + b


def _pick_batch_block(n_images, hw, itemsize=4):
    """Images per grid step + a generation-aware vmem limit.

    Double-buffered working set ~= (input + 3x output) * 2 buffers = 8x the
    input block.  Target ~4 MiB of input per step (~32 MiB working set) but
    never exceed ~60% of this chip's VMEM (v7x has only 64 MiB / TC).  Also
    cap the block so large batches get >= 4 grid steps (megacore sharding +
    pipeline depth on v7x; near-no-op on 1-TC v5e/v6e).
    """
    try:
        vmem_cap = int(pltpu.get_tpu_info().vmem_capacity_bytes)
    except Exception:
        vmem_cap = 64 << 20                      # conservative (v7x per-TC size)

    input_budget = min(4 << 20, (vmem_cap * 6 // 10) // 8)
    nb_budget = max(1, input_budget // (hw * itemsize))

    nb_split = -(-n_images // 4)                 # ceil(N / 4) -> >= 4 steps if possible
    nb_split = max(8, ((nb_split + 7) // 8) * 8)

    nb = min(nb_budget, nb_split)
    if nb >= n_images:
        nb = n_images                            # whole batch = full-dim block (allowed)
    else:
        nb = (nb // 8) * 8                       # sublane block dim must be a multiple of 8
        if nb < 8:
            # TODO(synk): image too large to split only along the batch axis with
            # a multiple-of-8 block; HW tiling would need explicit halo handling.
            nb = n_images

    working_set = 8 * nb * hw * itemsize
    vmem_limit = int(min(vmem_cap * 3 // 4,
                         max(40 << 20, working_set + (8 << 20))))
    return nb, vmem_limit


def quantile_regressor_forward(x_nchw, weights, biases):
    """x_nchw: (N, 1, H, W) float32. weights: (3, 3) taps per head. biases: (3,)."""
    N, C, H, W = x_nchw.shape
    assert C == 1, "in_channels=1"
    HW = H * W
    # Lane-dense store requirement: head slabs start at multiples of 128 only
    # when H*W is a multiple of 128 (otherwise stores degrade to masked vst.msk).
    assert HW % 128 == 0, "H*W must be a multiple of 128 for the lane-dense fast path"

    # base_model = identity (abstract in the reference module); free reshape, no copy.
    x_flat = x_nchw.reshape(N, HW).astype(jnp.float32)

    # pack taps + bias into one small 1-D SMEM table: (3 heads * 4,)
    wtab = (jnp.concatenate([weights, biases[:, None]], axis=1)
            .reshape(-1).astype(jnp.float32))

    # halo masks precomputed once (row 0: zero where flat < W; row 1: zero where
    # flat >= HW - W); padded to 8 sublanes so the resident block is fully aligned.
    lane = jnp.arange(HW, dtype=jnp.int32)
    masks = jnp.zeros((8, HW), jnp.float32)
    masks = masks.at[0].set((lane >= W).astype(jnp.float32))
    masks = masks.at[1].set((lane < HW - W).astype(jnp.float32))

    Nb, vmem_limit = _pick_batch_block(N, HW)
    grid = (pl.cdiv(N, Nb),)

    cost = pl.CostEstimate(
        flops=21 * N * HW,                        # 3 heads x (3 mul + 3 add + bias) / elem
        transcendentals=0,
        bytes_accessed=16 * N * HW,               # read input (4B) + write 3 heads (12B)
    )

    out_flat = pl.pallas_call(
        functools.partial(_quantile_conv_kernel, W=W, HW=HW),
        out_shape=jax.ShapeDtypeStruct((N, 3 * HW), jnp.float32),
        grid_spec=pltpu.PrefetchScalarGridSpec(
            num_scalar_prefetch=0,
            grid=grid,
            in_specs=[
                pl.BlockSpec(memory_space=pltpu.MemorySpace.SMEM),   # weight/bias table
                pl.BlockSpec((8, HW), lambda n: (0, 0)),             # halo masks (resident)
                pl.BlockSpec((Nb, HW), lambda n: (n, 0)),            # image block
            ],
            out_specs=pl.BlockSpec((Nb, 3 * HW), lambda n: (n, 0)),
        ),
        compiler_params=pltpu.CompilerParams(
            dimension_semantics=("parallel",),                       # megacore-shardable
            vmem_limit_bytes=vmem_limit,
        ),
        cost_estimate=cost,
    )(wtab, masks, x_flat)

    return out_flat.reshape(N, 3, H, W)                              # free reshape


def _reference(x_nchw, weights, biases):
    # pure-JAX reference: explicit H-direction 3-tap cross-correlation per head
    x = x_nchw[:, 0, :, :]
    H = x.shape[1]
    x_pad = jnp.pad(x, ((0, 0), (1, 1), (0, 0)))
    outs = []
    for q in range(3):
        y = (weights[q, 0] * x_pad[:, 0:H, :]
             + weights[q, 1] * x_pad[:, 1:H + 1, :]
             + weights[q, 2] * x_pad[:, 2:H + 2, :]
             + biases[q])
        outs.append(y[:, None, :, :])
    return jnp.concatenate(outs, axis=1)


if __name__ == "__main__":
    key = jax.random.PRNGKey(0)
    k_x, k_w, k_b, k_x2 = jax.random.split(key, 4)

    N, C, H, W = 2, 1, 16, 16
    x = jax.random.normal(k_x, (N, C, H, W), dtype=jnp.float32)

    # Deterministic Conv2d-style init: U(-bound, bound), bound = 1/sqrt(fan_in),
    # fan_in = in_channels * kh * kw = 1 * 3 * 1 = 3
    bound = 1.0 / jnp.sqrt(3.0)
    weights = jax.random.uniform(k_w, (3, 3), minval=-bound, maxval=bound,
                                 dtype=jnp.float32)   # (heads, taps)
    biases = jax.random.uniform(k_b, (3,), minval=-bound, maxval=bound,
                                dtype=jnp.float32)

    out = jax.block_until_ready(quantile_regressor_forward(x, weights, biases))
    ref = _reference(x, weights, biases)
    assert out.shape == (N, 3, H, W)
    assert jnp.allclose(out, ref, atol=1e-5, rtol=1e-5)

    # extra check: multi-step grid (Nb=8) with a remainder batch block (20 % 8 != 0)
    N2 = 20
    x2 = jax.random.normal(k_x2, (N2, C, H, W), dtype=jnp.float32)
    out2 = jax.block_until_ready(quantile_regressor_forward(x2, weights, biases))
    ref2 = _reference(x2, weights, biases)
    assert out2.shape == (N2, 3, H, W)
    assert jnp.allclose(out2, ref2, atol=1e-5, rtol=1e-5)

    print("KERNEL_OK")
</pallas_src>

<mosaic_0001>
module attributes {stable_mosaic.version = 11 : i64} {
  func.func @_quantile_conv_kernel(%arg0: i32, %arg1: memref<12xf32, #tpu.memory_space<smem>>, %arg2: memref<8x256xf32, #tpu.memory_space<vmem>>, %arg3: memref<2x256xf32, #tpu.memory_space<vmem>>, %arg4: memref<2x768xf32, #tpu.memory_space<vmem>>) attributes {dimension_semantics = [#tpu.dimension_semantics<parallel>], iteration_bounds = array<i64: 1>, scalar_prefetch = 0 : i64, scratch_operands = 0 : i64, tpu.core_type = #tpu.core_type<tc>, window_params = [{transform_indices = @transform_0, window_bounds = array<i64: 12>}, {pipeline_mode = #tpu.pipeline_mode<synchronous>, transform_indices = @transform_1, window_bounds = array<i64: 8, 256>}, {transform_indices = @transform_2, window_bounds = array<i64: 2, 256>}, {transform_indices = @transform_3, window_bounds = array<i64: 2, 768>}]} {
    %c0 = arith.constant 0 : index
    %c0_0 = arith.constant 0 : index
    %0 = vector.load %arg3[%c0, %c0_0] : memref<2x256xf32, #tpu.memory_space<vmem>>, vector<2x256xf32>
    %c0_1 = arith.constant 0 : index
    %c0_2 = arith.constant 0 : index
    %1 = vector.load %arg2[%c0_1, %c0_2] : memref<8x256xf32, #tpu.memory_space<vmem>>, vector<1x256xf32>
    %c1 = arith.constant 1 : index
    %c0_3 = arith.constant 0 : index
    %2 = vector.load %arg2[%c1, %c0_3] : memref<8x256xf32, #tpu.memory_space<vmem>>, vector<1x256xf32>
    %c16_i32 = arith.constant 16 : i32
    %3 = tpu.dynamic_rotate %0 by %c16_i32 dim 1 : vector<2x256xf32>, i32 -> vector<2x256xf32>
    %4 = vector.broadcast %1 : vector<1x256xf32> to vector<2x256xf32>
    %5 = arith.mulf %3, %4 : vector<2x256xf32>
    %c240_i32 = arith.constant 240 : i32
    %6 = tpu.dynamic_rotate %0 by %c240_i32 dim 1 : vector<2x256xf32>, i32 -> vector<2x256xf32>
    %7 = vector.broadcast %2 : vector<1x256xf32> to vector<2x256xf32>
    %8 = arith.mulf %6, %7 : vector<2x256xf32>
    %c0_4 = arith.constant 0 : index
    %9 = memref.load %arg1[%c0_4] : memref<12xf32, #tpu.memory_space<smem>>
    %c1_5 = arith.constant 1 : index
    %10 = memref.load %arg1[%c1_5] : memref<12xf32, #tpu.memory_space<smem>>
    %c2 = arith.constant 2 : index
    %11 = memref.load %arg1[%c2] : memref<12xf32, #tpu.memory_space<smem>>
    %c3 = arith.constant 3 : index
    %12 = memref.load %arg1[%c3] : memref<12xf32, #tpu.memory_space<smem>>
    %13 = vector.broadcast %9 : f32 to vector<2x256xf32>
    %14 = arith.mulf %13, %5 : vector<2x256xf32>
    %15 = vector.broadcast %10 : f32 to vector<2x256xf32>
    %16 = arith.mulf %15, %0 : vector<2x256xf32>
    %17 = arith.addf %14, %16 : vector<2x256xf32>
    %18 = vector.broadcast %11 : f32 to vector<2x256xf32>
    %19 = arith.mulf %18, %8 : vector<2x256xf32>
    %20 = arith.addf %17, %19 : vector<2x256xf32>
    %21 = vector.broadcast %12 : f32 to vector<2x256xf32>
    %22 = arith.addf %20, %21 : vector<2x256xf32>
    %c0_6 = arith.constant 0 : index
    %c0_7 = arith.constant 0 : index
    %23 = vector.load %arg4[%c0_6, %c0_7] : memref<2x768xf32, #tpu.memory_space<vmem>>, vector<2x256xf32>
    tpu.vector_store %arg4[%c0_6, %c0_7], %22 {strides = array<i32>} : memref<2x768xf32, #tpu.memory_space<vmem>>, vector<2x256xf32>,
    %c4 = arith.constant 4 : index
    %24 = memref.load %arg1[%c4] : memref<12xf32, #tpu.memory_space<smem>>
    %c5 = arith.constant 5 : index
    %25 = memref.load %arg1[%c5] : memref<12xf32, #tpu.memory_space<smem>>
    %c6 = arith.constant 6 : index
    %26 = memref.load %arg1[%c6] : memref<12xf32, #tpu.memory_space<smem>>
    %c7 = arith.constant 7 : index
    %27 = memref.load %arg1[%c7] : memref<12xf32, #tpu.memory_space<smem>>
    %28 = vector.broadcast %24 : f32 to vector<2x256xf32>
    %29 = arith.mulf %28, %5 : vector<2x256xf32>
    %30 = vector.broadcast %25 : f32 to vector<2x256xf32>
    %31 = arith.mulf %30, %0 : vector<2x256xf32>
    %32 = arith.addf %29, %31 : vector<2x256xf32>
    %33 = vector.broadcast %26 : f32 to vector<2x256xf32>
    %34 = arith.mulf %33, %8 : vector<2x256xf32>
    %35 = arith.addf %32, %34 : vector<2x256xf32>
    %36 = vector.broadcast %27 : f32 to vector<2x256xf32>
    %37 = arith.addf %35, %36 : vector<2x256xf32>
    %c0_8 = arith.constant 0 : index
    %c256 = arith.constant 256 : index
    %38 = vector.load %arg4[%c0_8, %c256] : memref<2x768xf32, #tpu.memory_space<vmem>>, vector<2x256xf32>
    tpu.vector_store %arg4[%c0_8, %c256], %37 {strides = array<i32>} : memref<2x768xf32, #tpu.memory_space<vmem>>, vector<2x256xf32>,
    %c8 = arith.constant 8 : index
    %39 = memref.load %arg1[%c8] : memref<12xf32, #tpu.memory_space<smem>>
    %c9 = arith.constant 9 : index
    %40 = memref.load %arg1[%c9] : memref<12xf32, #tpu.memory_space<smem>>
    %c10 = arith.constant 10 : index
    %41 = memref.load %arg1[%c10] : memref<12xf32, #tpu.memory_space<smem>>
    %c11 = arith.constant 11 : index
    %42 = memref.load %arg1[%c11] : memref<12xf32, #tpu.memory_space<smem>>
    %43 = vector.broadcast %39 : f32 to vector<2x256xf32>
    %44 = arith.mulf %43, %5 : vector<2x256xf32>
    %45 = vector.broadcast %40 : f32 to vector<2x256xf32>
    %46 = arith.mulf %45, %0 : vector<2x256xf32>
    %47 = arith.addf %44, %46 : vector<2x256xf32>
    %48 = vector.broadcast %41 : f32 to vector<2x256xf32>
    %49 = arith.mulf %48, %8 : vector<2x256xf32>
    %50 = arith.addf %47, %49 : vector<2x256xf32>
    %51 = vector.broadcast %42 : f32 to vector<2x256xf32>
    %52 = arith.addf %50, %51 : vector<2x256xf32>
    %c0_9 = arith.constant 0 : index
    %c512 = arith.constant 512 : index
    %53 = vector.load %arg4[%c0_9, %c512] : memref<2x768xf32, #tpu.memory_space<vmem>>, vector<2x256xf32>
    tpu.vector_store %arg4[%c0_9, %c512], %52 {strides = array<i32>} : memref<2x768xf32, #tpu.memory_space<vmem>>, vector<2x256xf32>,
    return
  }
  func.func @transform_0(%arg0: i32) -> i32 {
    %c0_i32 = arith.constant 0 : i32
    %c0_i32_0 = arith.constant 0 : i32
    return %c0_i32 : i32
  }
  func.func @transform_1(%arg0: i32) -> (i32, i32) {
    %c0_i32 = arith.constant 0 : i32
    %c0_i32_0 = arith.constant 0 : i32
    %c0_i32_1 = arith.constant 0 : i32
    return %c0_i32, %c0_i32_0 : i32, i32
  }
  func.func @transform_2(%arg0: i32) -> (i32, i32) {
    %c0_i32 = arith.constant 0 : i32
    %c0_i32_0 = arith.constant 0 : i32
    return %arg0, %c0_i32 : i32, i32
  }
  func.func @transform_3(%arg0: i32) -> (i32, i32) {
    %c0_i32 = arith.constant 0 : i32
    %c0_i32_0 = arith.constant 0 : i32
    return %arg0, %c0_i32 : i32, i32
  }
}

</mosaic_0001>

<bundles_post_ra>
// kernel: tpu_custom_call.1
= control target key start
LH: loop header
LB: loop body
LE: loop exit
PB: predicated region body
PF: predicated region fallthrough
CT: control target
= control target key end

     0   :  { %8 = vsyncpa [#allocation5], 0  ;;  %s414_s0 = inlined_call_operand.hbm [shape: f32[12], index: 0, kind: input, shape index: {}]   ;;  %s415_s1 = inlined_call_operand.hbm [shape: f32[8,256], index: 1, kind: input, shape index: {}]   ;;  %s416_s2 = inlined_call_operand.vmem [shape: f32[2,256], index: 2, kind: input, shape index: {}]   ;;  %s417_s3 = inlined_call_operand.hbm [shape: f32[2,768], index: 3, kind: output, shape index: {}]  }
   0x1   :  { %9 = vsyncpa [#allocation3], 0 }
   0x2   :  { %10 = vsyncpa [#allocation4], 0  ;;  %s257_s14 = scalar_lea.hbm %s414_s0, 16 }
   0x3   :  { %p258_p0 = scmp.ne.s32.totalorder %s414_s0, %s257_s14  ;;  %p261_p1 = scmp.lt.u32.totalorder %s257_s14, %s414_s0 }
   0x5   :  { %p263_p2 = pnand %p261_p1, %p258_p0 }
   0x7   :  { %266 = shalt.err (!%p263_p2)
}
   0x8   :  { %s317_s19 = smov [#allocation2]   ;;  %s318_s22 = smov [#allocation6]  }
   0x9   :  { %18 = dma.hbm_to_smem %s414_s0, 16, %s317_s19, [#allocation5]  }
   0xa   :  { %s25_s23 = sshll.u32 %s318_s22, 4  ;;  %s267_s26 = scalar_lea.hbm %s415_s1, 256  ;;  %s26_s23 = int_to_ptr.vmem [resolvable:$true] %s25_s23 }
   0xb   :  { %p268_p3 = scmp.ne.s32.totalorder %s415_s1, %s267_s26  ;;  %p271_p4 = scmp.lt.u32.totalorder %s267_s26, %s415_s1 }
   0xd   :  { %p273_p5 = pnand %p271_p4, %p268_p3 }
   0xf   :  { %276 = shalt.err (!%p273_p5)
}
  0x10   :  { %s277_s4 = scalar_lea.vmem %s26_s23, 256  ;;  %p282_p7 = scmp.lt.s32.totalorder %s26_s23, %s26_s23 }
  0x11   :  { %p278_p6 = scmp.ne.s32.totalorder %s26_s23, %s277_s4  ;;  %p283_p8 = scmp.lt.s32.totalorder %s277_s4, %s277_s4 }
  0x13   :  { %p284_p9 = por %p283_p8, %p282_p7 }
  0x15   :  { %p285_p10 = pnand %p284_p9, %p278_p6 }
  0x17   :  { %288 = shalt.err (!%p285_p10)
}
  0x18   :  { %28 = dma.hbm_to_vmem [thread:$0]  %s415_s1, 256, %s26_s23, [#allocation3]  }
  0x19   :  { %311 = dma.done.wait [#allocation5], 16  }
  0x1a   :  { %312 = vsyncadd [#allocation5], 4294967280 }
  0x1b   :  { %313 = dma.done.wait [#allocation3], 256  }
  0x1c   :  { %314 = vsyncadd [#allocation3], 4294967040 }
  0x1d   :  { %37 = sfence }
  0x1e   :  { %v46_v0 = vlaneseq  ;;  %v319_v1 = vmov 1983009808   ;;  %s237_s6 = sld [smem:[#allocation2 + $0x1]]  ;;  %s242_s7 = sld [smem:[#allocation2 + $0x5]]  ;;  %v38_v5 = vld [vmem:[%s416_s2] sm:$0xf] }
  0x1f   :  { %v44_v2 = vunpack.c.l.s4 %v319_v1  ;;  %s247_s8 = sld [smem:[#allocation2 + $0x9]]  ;;  %s320_s1 = smov 112   ;;  %v41_v18 = vld [vmem:[#allocation6 + $0x1] ss:$8 sm:$0x3] }
  0x20   :  { %v47_v3 = vshrl.u32 %v46_v0, 7  ;;  %s321_s11 = smov 16   ;;  %s372_s2 = sld [smem:[#allocation2 + $0x2]]  ;;  %v58_v19 = vand.u32 127, %v46_v0 }
  0x21   :  { %v45_v4 = vunpack.c.0.s8 %v44_v2  ;;  %s374_s12 = sld [smem:[#allocation2 + $0x6]]  ;;  %s376_s13 = sld [smem:[#allocation2 + $0xa]]  ;;  %v39_v22 = vld [vmem:[#allocation6] ss:$8 sm:$0x3] }
  0x22   :  { %s378_s14 = sld [smem:[#allocation2]]  ;;  %v65_v20 = vsub.s32 0, %v47_v3  ;;  %v69_v21 = vsub.s32 1, %v47_v3  ;;  %s380_s15 = sld [smem:[#allocation2 + $0x4]]  ;;  %vm79_vm0 = vcmp.lt.s32.totalorder %v58_v19, 112  ;;  %vm59_vm1 = vcmp.lt.s32.totalorder %v58_v19, 16 }
  0x23   :  { %v48_v6 = vsub.s32 %v45_v4, %v47_v3  ;;  %s382_s16 = sld [smem:[#allocation2 + $0x8]]  ;;  %s384_s17 = sld [smem:[#allocation2 + $0x3]] }
  0x24   :  { %v102_v8 = vstv %s237_s6  ;;  %v144_v9 = vstv %s242_s7  ;;  %v86_v25 = vrot.slane %v41_v18, %v65_v20  ;;  %v90_v26 = vrot.slane %v41_v18, %v69_v21  ;;  %s390_s18 = sld [smem:[#allocation2 + $0x7]]  ;;  %s392_s19 = sld [smem:[#allocation2 + $0xb]] }
  0x25   :  { %v49_v7 = vrot.slane %v38_v5, %v48_v6  ;;  %v103_v10 = vmul.f32 %v102_v8, %v38_v5  ;;  %v145_v11 = vmul.f32 %v144_v9, %v38_v5  ;;  %v186_v12 = vstv %s247_s8  ;;  %s322_s20 = smov [#allocation7]  }
  0x26   :  { %v187_v13 = vmul.f32 %v186_v12, %v38_v5  ;;  %v66_v27 = vrot.slane %v39_v22, %v65_v20  ;;  %v70_v28 = vrot.slane %v39_v22, %v69_v21  ;;  %v117_v29 = vstv %s372_s2  ;;  %s227_s21 = sshll.u32 %s322_s20, 4  ;;  %s228_s21 = int_to_ptr.vmem [resolvable:$true] %s227_s21 }
  0x27   :  { %75 = vrot.lane.b32.xlu1 %v49_v7, %s320_s1  ;;  %53 = vrot.lane.b32.xlu0 %v49_v7, %s321_s11  ;;  %v50_v14 = vcombine.high %v49_v7, %v49_v7  ;;  %v111_v15 = vrot.slane %v103_v10, %v48_v6  ;;  %v153_v16 = vrot.slane %v145_v11, %v48_v6  ;;  %v159_v30 = vstv %s374_s12  ;;  %s289_s22 = scalar_lea.vmem %s228_s21, 192  ;;  %p294_p12 = scmp.lt.s32.totalorder %s228_s21, %s228_s21 }
  0x28   :  { %v370_v17 = vrot.slane %v187_v13, %v48_v6  ;;  %v201_v31 = vstv %s376_s13  ;;  %v99_v33 = vstv %s378_s14  ;;  %v141_v44 = vstv %s380_s15  ;;  %p290_p11 = scmp.ne.s32.totalorder %s228_s21, %s289_s22  ;;  %p295_p13 = scmp.lt.s32.totalorder %s289_s22, %s289_s22 }
  0x29   :  { %v112_v43 = vcombine.high %v111_v15, %v111_v15  ;;  %v154_v45 = vcombine.high %v153_v16, %v153_v16  ;;  %v183_v46 = vstv %s382_s16  ;;  %v122_v50 = vstv %s384_s17 }
  0x2a   :  { %v196_v49 = vcombine.high %v370_v17, %v370_v17  ;;  %v164_v5 = vstv %s390_s18  ;;  %v206_v6 = vstv %s392_s19  ;;  %p296_p0 = por %p295_p13, %p294_p12 }
  0x2b   :  { %77 = vrot.lane.b32.xlu1 %v50_v14, %s320_s1  ;;  %55 = vrot.lane.b32.xlu0 %v50_v14, %s321_s11 }
  0x2c   :  { %p297_p1 = pnand %p296_p0, %p290_p11 }
  0x99   :  { %v76_v23 = vpop.permute.xlu1 %75  ;;  %v54_v24 = vpop.permute.xlu0 %53 }
  0x9d   :  { %v78_v32 = vpop.permute.xlu1 %77  ;;  %v56_v34 = vpop.permute.xlu0 %55 }
  0x9e   :  { %v80_v35 = vsel %vm79_vm0, %v76_v23, %v78_v32  ;;  %v81_v36 = vsel %vm79_vm0, %v78_v32, %v76_v23  ;;  %v60_v37 = vsel %vm59_vm1, %v54_v24, %v56_v34  ;;  %v61_v38 = vsel %vm59_vm1, %v56_v34, %v54_v24 }
  0x9f   :  { %v93_v39 = vmul.f32 %v86_v25, %v80_v35  ;;  %v94_v40 = vmul.f32 %v90_v26, %v81_v36  ;;  %v73_v41 = vmul.f32 %v66_v27, %v61_v38  ;;  %v74_v42 = vmul.f32 %v70_v28, %v60_v37 }
  0xa1   :  { %v118_v47 = vmul.f32 %v117_v29, %v93_v39  ;;  %v119_v48 = vmul.f32 %v117_v29, %v94_v40  ;;  %v160_v51 = vmul.f32 %v159_v30, %v93_v39  ;;  %v161_v52 = vmul.f32 %v159_v30, %v94_v40 }
  0xa2   :  { %v100_v53 = vmul.f32 %v99_v33, %v73_v41  ;;  %v101_v54 = vmul.f32 %v99_v33, %v74_v42  ;;  %v142_v55 = vmul.f32 %v141_v44, %v73_v41  ;;  %v143_v56 = vmul.f32 %v141_v44, %v74_v42 }
  0xa3   :  { %v184_v57 = vmul.f32 %v183_v46, %v73_v41  ;;  %v185_v58 = vmul.f32 %v183_v46, %v74_v42  ;;  %v202_v59 = vmul.f32 %v201_v31, %v93_v39  ;;  %v203_v60 = vmul.f32 %v201_v31, %v94_v40 }
  0xa4   :  { %v115_v61 = vadd.f32 %v111_v15, %v100_v53  ;;  %v116_v62 = vadd.f32 %v112_v43, %v101_v54  ;;  %v157_v63 = vadd.f32 %v153_v16, %v142_v55  ;;  %v158_v0 = vadd.f32 %v154_v45, %v143_v56 }
  0xa5   :  { %v199_v1 = vadd.f32 %v370_v17, %v184_v57  ;;  %v200_v2 = vadd.f32 %v196_v49, %v185_v58 }
  0xa6   :  { %v120_v3 = vadd.f32 %v118_v47, %v115_v61  ;;  %v121_v4 = vadd.f32 %v119_v48, %v116_v62  ;;  %v162_v7 = vadd.f32 %v160_v51, %v157_v63  ;;  %v163_v8 = vadd.f32 %v161_v52, %v158_v0 }
  0xa7   :  { %v204_v9 = vadd.f32 %v202_v59, %v199_v1  ;;  %v205_v10 = vadd.f32 %v203_v60, %v200_v2 }
  0xa8   :  { %v123_v11 = vadd.f32 %v122_v50, %v120_v3  ;;  %v124_v12 = vadd.f32 %v122_v50, %v121_v4  ;;  %v165_v13 = vadd.f32 %v164_v5, %v162_v7  ;;  %v166_v14 = vadd.f32 %v164_v5, %v163_v8 }
  0xa9   :  { %v207_v15 = vadd.f32 %v206_v6, %v204_v9  ;;  %v208_v16 = vadd.f32 %v206_v6, %v205_v10 }
  0xaa   :  { %v127_v18 = vcombine.low %v123_v11, %v124_v12  ;;  %v169_v19 = vcombine.low %v165_v13, %v166_v14 }
  0xab   :  { %v211_v17 = vcombine.low %v207_v15, %v208_v16 }
  0xac   :  { %240 = vst.sshfl [vmem:[#allocation7] sm:$0x33 pattern:$0x76325410] %v127_v18 }
  0xad   :  { %245 = vst.sshfl [vmem:[#allocation7 + $0x4] sm:$0x33 pattern:$0x76325410] %v169_v19 }
  0xae   :  { %250 = vst.sshfl [vmem:[#allocation7 + $0x8] sm:$0x33 pattern:$0x76325410] %v211_v17 }
  0xaf   :  { %300 = shalt.err (!%p297_p1)
}
  0xb0   :  { %s301_s25 = scalar_lea.hbm %s417_s3, 192 }
  0xb1   :  { %p302_p2 = scmp.ne.s32.totalorder %s417_s3, %s301_s25  ;;  %p305_p3 = scmp.lt.u32.totalorder %s301_s25, %s417_s3 }
  0xb3   :  { %p307_p4 = pnand %p305_p3, %p302_p2 }
  0xb5   :  { %310 = shalt.err (!%p307_p4)
}
  0xb6   :  { %230 = dma.vmem_to_hbm [thread:$0]  %s228_s21, 192, %s417_s3, [#allocation4]  }
  0xb7   :  { %315 = dma.done.wait [#allocation4], 192  }
  0xb8   :  { %316 = vsyncadd [#allocation4], 4294967104 }
  0xb9   :  { %234 = vsyncpa [#allocation3], 1 }
  0xba   :  { %235 = vsyncpa [#allocation4], 1 }
  0xbb   :  { %236 = vsyncpa [#allocation5], 1 }

</bundles_post_ra>
